<compile_context>
chip_gen: v7x
topology: tpu7x:2x2x1
jax: 0.10.0
libtpu: 0.0.40
codegen_flags: <defaults>
</compile_context>

<pallas_src>
import functools

import jax
import jax.numpy as jnp
from jax.experimental import pallas as pl
from jax.experimental.pallas import tpu as pltpu


def _round_up(x, m):
    return ((x + m - 1) // m) * m


def _bn_stats_kernel(x_ref, w_ref, sum_ref, sq_ref):
    """Pass 1: accumulate per-channel sum(z) and sum(z*z) across M tiles.

    x_ref: (TM, ic), w_ref: (ic, oc); sum_ref / sq_ref: (1, oc) resident accumulators.
    """
    @pl.when(pl.program_id(0) == 0)
    def _init():
        sum_ref[...] = jnp.zeros_like(sum_ref)
        sq_ref[...] = jnp.zeros_like(sq_ref)

    z = jnp.dot(x_ref[...], w_ref[...], preferred_element_type=jnp.float32)
    sum_ref[...] += jnp.sum(z, axis=0, keepdims=True)
    sq_ref[...] += jnp.sum(z * z, axis=0, keepdims=True)


def _mlp_apply_kernel(x_ref, w_ref, scale_ref, shift_ref, o_ref, *, affine, nl):
    """Pass 2: z = x @ W, then fused per-channel affine (folded BN) + activation."""
    z = jnp.dot(x_ref[...], w_ref[...], preferred_element_type=jnp.float32)
    if affine:
        z = z * scale_ref[...] + shift_ref[...]
    if nl == "relu":
        z = jnp.maximum(z, 0.0)
    elif nl == "tanh":
        z = jnp.tanh(z)
    elif nl == "sigmoid":
        z = jax.nn.sigmoid(z)
    # nl == "none": passthrough
    o_ref[...] = z.astype(o_ref.dtype)


def mlp_forward(x, w, gamma, beta, *, is_bn=True, nl="relu", eps=1e-5,
                tile_m=1024):
    """x: (B, N, ic) f32; w: (oc, ic); gamma/beta: (oc,). Returns (B, N, oc)."""
    assert nl in ("none", "relu", "tanh", "sigmoid")
    B, N, ic = x.shape
    oc = w.shape[0]
    M = B * N

    # Row-tile: multiple of 8, capped so double-buffered f32 (TM,ic)+(TM,oc) blocks
    # stay well under the scoped-VMEM default on every generation (v7x included).
    tm = min(_round_up(M, 8), int(tile_m))
    Mp = _round_up(M, tm)
    grid_m = Mp // tm

    x2d = x.reshape(M, ic)
    if Mp != M:
        # Zero padding rows are inert for the BN sums; their outputs get sliced off.
        x2d = jnp.pad(x2d, ((0, Mp - M), (0, 0)))
    w_t = jnp.transpose(w).astype(x.dtype)  # (ic, oc): lane axis = oc for the MXU

    x_spec = pl.BlockSpec((tm, ic), lambda i: (i, 0))
    w_spec = pl.BlockSpec((ic, oc), lambda i: (0, 0))
    vec_spec = pl.BlockSpec((1, oc), lambda i: (0, 0))

    if is_bn:
        # ---- Pass 1: per-channel statistics (accumulator output across the M grid).
        z_sum, z_sq = pl.pallas_call(
            _bn_stats_kernel,
            out_shape=(jax.ShapeDtypeStruct((1, oc), jnp.float32),
                       jax.ShapeDtypeStruct((1, oc), jnp.float32)),
            grid=(grid_m,),
            in_specs=[x_spec, w_spec],
            out_specs=(vec_spec, vec_spec),
            compiler_params=pltpu.CompilerParams(
                dimension_semantics=("arbitrary",)),
        )(x2d, w_t)

        mean = z_sum / M                                   # (1, oc), f32
        var = jnp.maximum(z_sq / M - mean * mean, 0.0)     # biased var, guard cancellation
        scale = gamma.reshape(1, oc).astype(jnp.float32) * jax.lax.rsqrt(var + eps)
        shift = beta.reshape(1, oc).astype(jnp.float32) - mean * scale
        affine = True
    else:
        scale = jnp.ones((1, oc), jnp.float32)
        shift = jnp.zeros((1, oc), jnp.float32)
        affine = False

    # ---- Pass 2: matmul + folded BN + activation, independent tiles ("parallel").
    kernel = functools.partial(_mlp_apply_kernel, affine=affine, nl=nl)
    out2d = pl.pallas_call(
        kernel,
        out_shape=jax.ShapeDtypeStruct((Mp, oc), x.dtype),
        grid=(grid_m,),
        in_specs=[x_spec, w_spec, vec_spec, vec_spec],
        out_specs=pl.BlockSpec((tm, oc), lambda i: (i, 0)),
        compiler_params=pltpu.CompilerParams(
            dimension_semantics=("parallel",)),
    )(x2d, w_t, scale, shift)

    return out2d[:M].reshape(B, N, oc)


def _reference(x, w, gamma, beta, *, is_bn, nl, eps=1e-5):
    """Pure-JAX reference mirroring the PyTorch forward."""
    z = jnp.einsum("bni,oi->bno", x, w)
    if is_bn:
        mean = jnp.mean(z, axis=(0, 1), keepdims=True)
        var = jnp.mean((z - mean) ** 2, axis=(0, 1), keepdims=True)
        z = (z - mean) / jnp.sqrt(var + eps)
        z = z * gamma.reshape(1, 1, -1) + beta.reshape(1, 1, -1)
    if nl == "relu":
        z = jnp.maximum(z, 0.0)
    elif nl == "tanh":
        z = jnp.tanh(z)
    elif nl == "sigmoid":
        z = jax.nn.sigmoid(z)
    return z


if __name__ == "__main__":
    key = jax.random.PRNGKey(0)
    kx, kw, kg, kb, kx2 = jax.random.split(key, 5)

    # ---- Config 1: small shape matching the module, BN + ReLU, single tile.
    B, N, ic, oc = 2, 16, 8, 32
    x = jax.random.normal(kx, (B, N, ic), dtype=jnp.float32)
    # Conv2d(ic, oc, 1, bias=False) weight is (oc, ic, 1, 1) -> squeezed to (oc, ic).
    bound = 1.0 / jnp.sqrt(jnp.float32(ic))
    w = jax.random.uniform(kw, (oc, ic), minval=-bound, maxval=bound,
                           dtype=jnp.float32)
    gamma = 1.0 + 0.1 * jax.random.normal(kg, (oc,), dtype=jnp.float32)
    beta = 0.1 * jax.random.normal(kb, (oc,), dtype=jnp.float32)

    y = mlp_forward(x, w, gamma, beta, is_bn=True, nl="relu")
    y = jax.block_until_ready(y)
    y_ref = _reference(x, w, gamma, beta, is_bn=True, nl="relu")
    assert y.shape == (B, N, oc)
    assert jnp.allclose(y, y_ref, atol=1e-4, rtol=1e-4), "mismatch (bn+relu)"

    # ---- Config 2: multi-tile path with ragged M (padding + cross-tile BN stats),
    #      sigmoid activation.  Small tile_m forces grid > 1.
    B2, N2 = 2, 300   # M = 600 -> tm = 256, padded to 768, grid = 3
    x2 = jax.random.normal(kx2, (B2, N2, ic), dtype=jnp.float32)
    y2 = mlp_forward(x2, w, gamma, beta, is_bn=True, nl="sigmoid", tile_m=256)
    y2 = jax.block_until_ready(y2)
    y2_ref = _reference(x2, w, gamma, beta, is_bn=True, nl="sigmoid")
    assert y2.shape == (B2, N2, oc)
    assert jnp.allclose(y2, y2_ref, atol=1e-4, rtol=1e-4), "mismatch (tiled bn+sigmoid)"

    # ---- Config 3: no BN, tanh (exercise the affine-free path).
    y3 = mlp_forward(x, w, gamma, beta, is_bn=False, nl="tanh")
    y3 = jax.block_until_ready(y3)
    y3_ref = _reference(x, w, gamma, beta, is_bn=False, nl="tanh")
    assert jnp.allclose(y3, y3_ref, atol=1e-5, rtol=1e-5), "mismatch (no-bn tanh)"

    print("KERNEL_OK")
</pallas_src>

<mosaic_0001>
module attributes {stable_mosaic.version = 11 : i64} {
  func.func @_bn_stats_kernel(%arg0: i32, %arg1: memref<32x8xf32, #tpu.memory_space<vmem>>, %arg2: memref<8x32xf32, #tpu.memory_space<vmem>>, %arg3: memref<1x32xf32, #tpu.memory_space<vmem>>, %arg4: memref<1x32xf32, #tpu.memory_space<vmem>>) attributes {dimension_semantics = [#tpu.dimension_semantics<arbitrary>], iteration_bounds = array<i64: 1>, scalar_prefetch = 0 : i64, scratch_operands = 0 : i64, tpu.core_type = #tpu.core_type<tc>, window_params = [{transform_indices = @transform_0, window_bounds = array<i64: 32, 8>}, {pipeline_mode = #tpu.pipeline_mode<synchronous>, transform_indices = @transform_1, window_bounds = array<i64: 8, 32>}, {pipeline_mode = #tpu.pipeline_mode<synchronous>, transform_indices = @transform_2, window_bounds = array<i64: 1, 32>}, {pipeline_mode = #tpu.pipeline_mode<synchronous>, transform_indices = @transform_3, window_bounds = array<i64: 1, 32>}]} {
    %c0_i32 = arith.constant 0 : i32
    %0 = arith.cmpi eq, %arg0, %c0_i32 : i32
    %1 = arith.extui %0 : i1 to i32
    %c0_i32_0 = arith.constant 0 : i32
    %2 = arith.cmpi ne, %1, %c0_i32_0 : i32
    scf.if %2 {
      %cst_14 = arith.constant 0.000000e+00 : f32
      %17 = vector.broadcast %cst_14 : f32 to vector<1x32xf32>
      %c0_15 = arith.constant 0 : index
      %c0_16 = arith.constant 0 : index
      %18 = vector.load %arg3[%c0_15, %c0_16] : memref<1x32xf32, #tpu.memory_space<vmem>>, vector<1x32xf32>
      tpu.vector_store %arg3[%c0_15, %c0_16], %17 {strides = array<i32>} : memref<1x32xf32, #tpu.memory_space<vmem>>, vector<1x32xf32>,
      %cst_17 = arith.constant 0.000000e+00 : f32
      %19 = vector.broadcast %cst_17 : f32 to vector<1x32xf32>
      %c0_18 = arith.constant 0 : index
      %c0_19 = arith.constant 0 : index
      %20 = vector.load %arg4[%c0_18, %c0_19] : memref<1x32xf32, #tpu.memory_space<vmem>>, vector<1x32xf32>
      tpu.vector_store %arg4[%c0_18, %c0_19], %19 {strides = array<i32>} : memref<1x32xf32, #tpu.memory_space<vmem>>, vector<1x32xf32>,
    } else {
    }
    %c0 = arith.constant 0 : index
    %c0_1 = arith.constant 0 : index
    %3 = vector.load %arg1[%c0, %c0_1] : memref<32x8xf32, #tpu.memory_space<vmem>>, vector<32x8xf32>
    %c0_2 = arith.constant 0 : index
    %c0_3 = arith.constant 0 : index
    %4 = vector.load %arg2[%c0_2, %c0_3] : memref<8x32xf32, #tpu.memory_space<vmem>>, vector<8x32xf32>
    %cst = arith.constant dense<0.000000e+00> : vector<32x32xf32>
    %5 = tpu.matmul %3, %4, %cst {dimension_numbers = #tpu.dot_dimension_numbers<[1], [0], [0], [1], [0, 0, 1, 1], [], []>} : vector<32x8xf32>, vector<8x32xf32>, vector<32x32xf32> -> vector<32x32xf32>
    %c0_4 = arith.constant 0 : index
    %c0_5 = arith.constant 0 : index
    %6 = vector.load %arg3[%c0_4, %c0_5] : memref<1x32xf32, #tpu.memory_space<vmem>>, vector<1x32xf32>
    %cst_6 = arith.constant dense<0.000000e+00> : vector<32xf32>
    %7 = vector.multi_reduction <add>, %5, %cst_6 [0] : vector<32x32xf32> to vector<32xf32>
    %8 = vector.shape_cast %7 : vector<32xf32> to vector<1x32xf32>
    %9 = arith.addf %6, %8 : vector<1x32xf32>
    %c0_7 = arith.constant 0 : index
    %c0_8 = arith.constant 0 : index
    %10 = vector.load %arg3[%c0_7, %c0_8] : memref<1x32xf32, #tpu.memory_space<vmem>>, vector<1x32xf32>
    tpu.vector_store %arg3[%c0_7, %c0_8], %9 {strides = array<i32>} : memref<1x32xf32, #tpu.memory_space<vmem>>, vector<1x32xf32>,
    %c0_9 = arith.constant 0 : index
    %c0_10 = arith.constant 0 : index
    %11 = vector.load %arg4[%c0_9, %c0_10] : memref<1x32xf32, #tpu.memory_space<vmem>>, vector<1x32xf32>
    %12 = arith.mulf %5, %5 : vector<32x32xf32>
    %cst_11 = arith.constant dense<0.000000e+00> : vector<32xf32>
    %13 = vector.multi_reduction <add>, %12, %cst_11 [0] : vector<32x32xf32> to vector<32xf32>
    %14 = vector.shape_cast %13 : vector<32xf32> to vector<1x32xf32>
    %15 = arith.addf %11, %14 : vector<1x32xf32>
    %c0_12 = arith.constant 0 : index
    %c0_13 = arith.constant 0 : index
    %16 = vector.load %arg4[%c0_12, %c0_13] : memref<1x32xf32, #tpu.memory_space<vmem>>, vector<1x32xf32>
    tpu.vector_store %arg4[%c0_12, %c0_13], %15 {strides = array<i32>} : memref<1x32xf32, #tpu.memory_space<vmem>>, vector<1x32xf32>,
    return
  }
  func.func @transform_0(%arg0: i32) -> (i32, i32) {
    %c0_i32 = arith.constant 0 : i32
    %c0_i32_0 = arith.constant 0 : i32
    return %arg0, %c0_i32 : i32, i32
  }
  func.func @transform_1(%arg0: i32) -> (i32, i32) {
    %c0_i32 = arith.constant 0 : i32
    %c0_i32_0 = arith.constant 0 : i32
    %c0_i32_1 = arith.constant 0 : i32
    return %c0_i32, %c0_i32_0 : i32, i32
  }
  func.func @transform_2(%arg0: i32) -> (i32, i32) {
    %c0_i32 = arith.constant 0 : i32
    %c0_i32_0 = arith.constant 0 : i32
    %c0_i32_1 = arith.constant 0 : i32
    return %c0_i32, %c0_i32_0 : i32, i32
  }
  func.func @transform_3(%arg0: i32) -> (i32, i32) {
    %c0_i32 = arith.constant 0 : i32
    %c0_i32_0 = arith.constant 0 : i32
    %c0_i32_1 = arith.constant 0 : i32
    return %c0_i32, %c0_i32_0 : i32, i32
  }
}

</mosaic_0001>

<bundles_post_ra>
// kernel: tpu_custom_call.1
= control target key start
LH: loop header
LB: loop body
LE: loop exit
PB: predicated region body
PF: predicated region fallthrough
CT: control target
= control target key end

     0   :  { %9 = vsyncpa [#allocation3], 0  ;;  %vm27_vm0 = vcmask 64512   ;;  %s343_s0 = inlined_call_operand.vmem [shape: f32[32,8], index: 0, kind: input, shape index: {}]   ;;  %s344_s1 = inlined_call_operand.vmem [shape: f32[8,32], index: 1, kind: input, shape index: {}]   ;;  %s345_s2 = inlined_call_operand.hbm [shape: f32[1,32], index: 2, kind: output, shape index: {0}]   ;;  %s346_s3 = inlined_call_operand.hbm [shape: f32[1,32], index: 3, kind: output, shape index: {1}]  }
   0x1   :  { %v26_v0 = vld [vmem:[%s344_s1] sm:$0xff]  ;;  %v23_v2 = vld [vmem:[%s343_s0 + $0x8] sm:$0xff]  ;;  %v24_v3 = vld [vmem:[%s343_s0 + $0x10] sm:$0xff] }
   0x2   :  { %v22_v1 = vld [vmem:[%s343_s0] sm:$0xff]  ;;  %200 = vmatprep.subr.mxu0 %v26_v0  ;;  %208 = vmatprep.subr.mxu1 %v26_v0 }
   0x3   :  { %10 = vsyncpa [#allocation5], 0  ;;  %201 = vmatpush3.msra.mxu0 %v26_v0  ;;  %202 = vmatprep.mubr.msk.f32.mxu0 %vm27_vm0, %v22_v1  ;;  %v25_v4 = vld [vmem:[%s343_s0 + $0x18] sm:$0xff]  ;;  %vm19_vm1 = vcmask 253952   ;;  %v261_v5 = vmov 0.0   ;;  %vm126_vm2 = vcmask 261120  }
   0x4   :  { %209 = vmatpush3.msra.mxu1 %v26_v0  ;;  %203 = vmatmul.mubr.msk.f32.vlgmr.msra.gmra.mrb[0].mxu0 %vm27_vm0, %v23_v2  ;;  %20 = vst.msk [vmem:[#allocation2] sm:$0x1] %vm19_vm1, %v261_v5  ;;  %21 = vst.msk [vmem:[#allocation4] sm:$0x1] %vm19_vm1, %v261_v5  ;;  %s262_s0 = smov [#allocation2]   ;;  %s263_s22 = smov [#allocation4]  }
   0x5   :  { %205 = vmatprep.mubr.msk.f32.mxu1 %vm27_vm0, %v24_v3  ;;  %s169_s21 = sshll.u32 %s262_s0, 4  ;;  %s179_s23 = sshll.u32 %s263_s22, 4  ;;  %s170_s21 = int_to_ptr.vmem [resolvable:$true] %s169_s21  ;;  %s310_s23 = int_to_ptr.vmem [resolvable:$true] %s179_s23 }
   0x6   :  { %206 = vmatmul.mubr.msk.f32.vlgmr.msra.gmra.mrb[0].mxu1 %vm27_vm0, %v25_v4  ;;  %s213_s24 = scalar_lea.vmem %s170_s21, 16  ;;  %s217_s25 = scalar_lea.vmem %s170_s21, 32 }
   0x7   :  { %p214_p0 = scmp.ne.s32.totalorder %s170_s21, %s213_s24  ;;  %p218_p1 = scmp.lt.s32.totalorder %s170_s21, %s170_s21 }
   0x8   :  { %p219_p2 = scmp.lt.s32.totalorder %s217_s25, %s213_s24 }
   0xa   :  { %p220_p3 = por %p219_p2, %p218_p1 }
   0xb   :  { %v125_v37 = vld [vmem:[#allocation2] sm:$0x1]  ;;  %v143_v40 = vld [vmem:[#allocation4] sm:$0x1] }
   0xc   :  { %p221_p4 = pnand %p220_p3, %p214_p0 }
  0xd7   :  { %v204_v6 = vpop.f32.mrb[0].mxu0 }
  0xd8   :  { %v128_v7 = vsel %vm126_vm2, %v204_v6, 0.0  ;;  %v145_v8 = vmul.f32 %v204_v6, %v204_v6  ;;  %v106_v9 = vpop.f32.mrb[1].mxu0 }
  0xd9   :  { %v127_v10 = vsel %vm126_vm2, %v106_v9, 0.0  ;;  %v144_v11 = vmul.f32 %v106_v9, %v106_v9  ;;  %v207_v12 = vpop.f32.mrb[0].mxu1 }
  0xda   :  { %v149_v13 = vsel %vm126_vm2, %v145_v8, 0.0  ;;  %v129_v14 = vadd.f32 %v128_v7, %v127_v10  ;;  %v116_v15 = vpop.f32.mrb[1].mxu1  ;;  %v147_v17 = vmul.f32 %v207_v12, %v207_v12  ;;  %v132_v22 = vsel %vm126_vm2, %v207_v12, 0.0 }
  0xdb   :  { %v148_v16 = vsel %vm126_vm2, %v144_v11, 0.0  ;;  %v130_v18 = vsel %vm126_vm2, %v116_v15, 0.0  ;;  %v146_v19 = vmul.f32 %v116_v15, %v116_v15 }
  0xdc   :  { %v150_v20 = vadd.f32 %v149_v13, %v148_v16  ;;  %v131_v21 = vadd.f32 %v130_v18, %v129_v14  ;;  %v153_v26 = vsel %vm126_vm2, %v147_v17, 0.0 }
  0xdd   :  { %v151_v23 = vsel %vm126_vm2, %v146_v19, 0.0 }
  0xde   :  { %v133_v24 = vadd.f32 %v132_v22, %v131_v21  ;;  %v152_v25 = vadd.f32 %v151_v23, %v150_v20 }
  0xe0   :  { %v134_v27 = vrot.slane %v133_v24, 4  ;;  %v154_v28 = vadd.f32 %v153_v26, %v152_v25 }
  0xe2   :  { %v135_v29 = vadd.f32 %v134_v27, %v133_v24  ;;  %v155_v30 = vrot.slane %v154_v28, 4 }
  0xe4   :  { %v136_v31 = vrot.slane %v135_v29, 2  ;;  %v156_v32 = vadd.f32 %v155_v30, %v154_v28 }
  0xe6   :  { %v137_v33 = vadd.f32 %v136_v31, %v135_v29  ;;  %v157_v34 = vrot.slane %v156_v32, 2 }
  0xe8   :  { %v158_v35 = vadd.f32 %v157_v34, %v156_v32  ;;  %v138_v36 = vrot.slane %v137_v33, 1 }
  0xea   :  { %v139_v38 = vadd.f32 %v138_v36, %v137_v33  ;;  %v159_v39 = vrot.slane %v158_v35, 1 }
  0xec   :  { %v140_v41 = vadd.f32 %v139_v38, %v125_v37  ;;  %v160_v42 = vadd.f32 %v159_v39, %v158_v35 }
  0xee   :  { %142 = vst.msk [vmem:[#allocation2] sm:$0x1] %vm19_vm1, %v140_v41  ;;  %v161_v43 = vadd.f32 %v160_v42, %v143_v40 }
  0xef   :  { %224 = shalt.err (!%p221_p4)
}
  0xf0   :  { %s225_s28 = scalar_lea.hbm %s345_s2, 16 }
  0xf1   :  { %p226_p5 = scmp.ne.s32.totalorder %s345_s2, %s225_s28  ;;  %p229_p6 = scmp.lt.u32.totalorder %s225_s28, %s345_s2 }
  0xf3   :  { %p231_p7 = pnand %p229_p6, %p226_p5 }
  0xf5   :  { %234 = shalt.err (!%p231_p7)
}
  0xf6   :  { %172 = dma.vmem_to_hbm [thread:$0]  %s170_s21, 16, %s345_s2, [#allocation3]   ;;  %162 = vst.msk [vmem:[#allocation4] sm:$0x1] %vm19_vm1, %v161_v43 }
  0xf7   :  { %s235_s8 = scalar_lea.vmem %s310_s23, 16  ;;  %s239_s9 = scalar_lea.vmem %s310_s23, 32 }
  0xf8   :  { %p236_p8 = scmp.ne.s32.totalorder %s310_s23, %s235_s8  ;;  %p240_p9 = scmp.lt.s32.totalorder %s310_s23, %s310_s23 }
  0xf9   :  { %p241_p10 = scmp.lt.s32.totalorder %s239_s9, %s235_s8 }
  0xfb   :  { %p242_p11 = por %p241_p10, %p240_p9 }
  0xfd   :  { %p243_p12 = pnand %p242_p11, %p236_p8 }
  0xff   :  { %246 = shalt.err (!%p243_p12)
}
 0x100   :  { %s247_s12 = scalar_lea.hbm %s346_s3, 16 }
 0x101   :  { %p248_p13 = scmp.ne.s32.totalorder %s346_s3, %s247_s12  ;;  %p251_p0 = scmp.lt.u32.totalorder %s247_s12, %s346_s3 }
 0x103   :  { %p253_p1 = pnand %p251_p0, %p248_p13 }
 0x105   :  { %256 = shalt.err (!%p253_p1)
}
 0x106   :  { %182 = dma.vmem_to_hbm [thread:$0]  %s310_s23, 16, %s346_s3, [#allocation5]  }
 0x107   :  { %257 = dma.done.wait [#allocation3], 16  }
 0x108   :  { %258 = vsyncadd [#allocation3], 4294967280 }
 0x109   :  { %259 = dma.done.wait [#allocation5], 16  }
 0x10a   :  { %260 = vsyncadd [#allocation5], 4294967280 }
 0x10b   :  { %189 = vsyncpa [#allocation3], 1 }
 0x10c   :  { %190 = vsyncpa [#allocation5], 1 }

</bundles_post_ra>
